<compile_context>
chip_gen: v7x
topology: tpu7x:2x2x1
jax: 0.10.0
libtpu: 0.0.40
codegen_flags: <defaults>
</compile_context>

<pallas_src>
import functools

import jax
import jax.numpy as jnp
from jax.experimental import pallas as pl
from jax.experimental.pallas import tpu as pltpu


def _round_up(x, m):
    return ((x + m - 1) // m) * m


def _fused_qkv_kernel(x_ref, w_ref, b_ref, o_ref):
    """One grid step: (TM, D_in) @ (D_in, 3H_pad) + bias -> (TM, 3H_pad)."""
    o_ref[...] = (
        jnp.dot(x_ref[...], w_ref[...], preferred_element_type=jnp.float32)
        + b_ref[...]
    ).astype(o_ref.dtype)


def init_attention_params(key, hidden_dim, is_bi_rnn, dtype=jnp.float32):
    """Deterministic init matching nn.Linear shapes: W is (out, in), b is (out,)."""
    d_in = 2 * hidden_dim if is_bi_rnn else hidden_dim
    bound = 1.0 / jnp.sqrt(jnp.asarray(d_in, jnp.float32))
    keys = jax.random.split(key, 6)

    def lin(kw, kb):
        w = jax.random.uniform(kw, (hidden_dim, d_in), dtype, -bound, bound)
        b = jax.random.uniform(kb, (hidden_dim,), dtype, -bound, bound)
        return w, b

    wq, bq = lin(keys[0], keys[1])
    wk, bk = lin(keys[2], keys[3])
    wv, bv = lin(keys[4], keys[5])
    return dict(wq=wq, bq=bq, wk=wk, bk=bk, wv=wv, bv=bv)


def fuse_qkv_params(params):
    """Transpose + concat + lane-pad the Q/K/V weights ONCE (not per forward).

    Returns:
      w_fused: (D_in, N_pad) with N_pad = round_up(3H, 128), zero-padded cols
      b_fused: (1, N_pad)
      H:       hidden_dim (for splitting the fused output)
    """
    H, d_in = params["wq"].shape
    # nn.Linear computes x @ W.T + b -> store W pre-transposed as (D_in, H).
    w_cat = jnp.concatenate(
        [params["wq"].T, params["wk"].T, params["wv"].T], axis=1
    )  # (D_in, 3H)
    b_cat = jnp.concatenate(
        [params["bq"], params["bk"], params["bv"]], axis=0
    ).reshape(1, 3 * H)

    n = 3 * H
    n_pad = _round_up(n, 128)  # lane-dense output: unmasked vst, full MXU width
    w_fused = jnp.pad(w_cat, ((0, 0), (0, n_pad - n)))
    b_fused = jnp.pad(b_cat, ((0, 0), (0, n_pad - n)))
    return w_fused, b_fused, H


@functools.partial(jax.jit, static_argnames=("hidden_dim",))
def attention_forward(inputs, lens, w_fused, b_fused, hidden_dim):
    """Pallas-backed equivalent of Attention.forward's computed quantities.

    inputs:  (B, S, D_in) float32
    lens:    (B,) int32   -- unused (forward in the reference is truncated)
    w_fused: (D_in, N_pad) pre-fused/transposed QKV weight
    b_fused: (1, N_pad)    pre-fused QKV bias
    returns (Q, K, V), each (B, S, hidden_dim)
    """
    del lens  # not used by the (truncated) reference forward
    B, S, D_in = inputs.shape
    H = hidden_dim
    N_pad = w_fused.shape[1]
    M = B * S

    # Row tiling: target 512 rows/tile (good HBM-roofline utilization) but
    # never larger than the (8-rounded) problem, and keep VMEM use modest so
    # the same kernel fits v5e/v6e (128 MiB) and v7x (64 MiB) default scoped
    # VMEM: 2*TM*(D_in+N_pad)*4B double-buffered tiles + resident weights.
    TM = min(512, _round_up(M, 8))
    budget = 24 * 1024 * 1024
    resident = D_in * N_pad * 4 + N_pad * 4
    while TM > 8 and resident + 2 * TM * (D_in + N_pad) * 4 > budget:
        TM //= 2
    TM = max(TM, 8)

    M_pad = _round_up(M, TM)
    x2d = inputs.reshape(M, D_in)
    if M_pad != M:
        x2d = jnp.pad(x2d, ((0, M_pad - M), (0, 0)))

    grid = (M_pad // TM,)
    cost = pl.CostEstimate(
        flops=2 * M_pad * D_in * N_pad,
        transcendentals=0,
        bytes_accessed=4 * (M_pad * D_in + D_in * N_pad + M_pad * N_pad),
    )

    out2d = pl.pallas_call(
        _fused_qkv_kernel,
        out_shape=jax.ShapeDtypeStruct((M_pad, N_pad), inputs.dtype),
        grid=grid,
        in_specs=[
            pl.BlockSpec((TM, D_in), lambda i: (i, 0)),      # streamed input tile
            pl.BlockSpec((D_in, N_pad), lambda i: (0, 0)),   # resident fused weight
            pl.BlockSpec((1, N_pad), lambda i: (0, 0)),      # resident fused bias
        ],
        out_specs=pl.BlockSpec((TM, N_pad), lambda i: (i, 0)),
        compiler_params=pltpu.CompilerParams(
            dimension_semantics=("parallel",),
        ),
        cost_estimate=cost,
    )(x2d, w_fused, b_fused)

    qkv = out2d[:M, : 3 * H].reshape(B, S, 3 * H)
    q = qkv[..., 0 * H : 1 * H]
    k = qkv[..., 1 * H : 2 * H]
    v = qkv[..., 2 * H : 3 * H]
    return q, k, v


def _reference_forward(inputs, lens, params):
    """Pure-JAX reference (mirrors nn.Linear semantics) for validation."""
    del lens
    q = jnp.einsum("bsd,hd->bsh", inputs, params["wq"]) + params["bq"]
    k = jnp.einsum("bsd,hd->bsh", inputs, params["wk"]) + params["bk"]
    v = jnp.einsum("bsd,hd->bsh", inputs, params["wv"]) + params["bv"]
    return q, k, v


if __name__ == "__main__":
    hidden_dim = 32
    is_bi_rnn = True
    B, S = 2, 8
    d_in = 2 * hidden_dim if is_bi_rnn else hidden_dim

    key = jax.random.PRNGKey(0)
    k_x, k_p = jax.random.split(key)
    inputs = jax.random.normal(k_x, (B, S, d_in), jnp.float32)
    lens = jnp.full((B,), S, jnp.int32)
    params = init_attention_params(k_p, hidden_dim, is_bi_rnn)

    # Fuse / transpose / pad the QKV weights once (outside the forward).
    w_fused, b_fused, H = fuse_qkv_params(params)

    q, k, v = attention_forward(inputs, lens, w_fused, b_fused, hidden_dim=H)
    jax.block_until_ready((q, k, v))

    q_ref, k_ref, v_ref = _reference_forward(inputs, lens, params)
    assert q.shape == (B, S, hidden_dim)
    assert k.shape == (B, S, hidden_dim)
    assert v.shape == (B, S, hidden_dim)
    assert jnp.allclose(q, q_ref, atol=1e-4, rtol=1e-4)
    assert jnp.allclose(k, k_ref, atol=1e-4, rtol=1e-4)
    assert jnp.allclose(v, v_ref, atol=1e-4, rtol=1e-4)

    print("KERNEL_OK")
</pallas_src>

<mosaic_0001>
module attributes {stable_mosaic.version = 11 : i64} {
  func.func @_fused_qkv_kernel(%arg0: i32, %arg1: memref<16x64xf32, #tpu.memory_space<vmem>>, %arg2: memref<64x128xf32, #tpu.memory_space<vmem>>, %arg3: memref<1x128xf32, #tpu.memory_space<vmem>>, %arg4: memref<16x128xf32, #tpu.memory_space<vmem>>) attributes {dimension_semantics = [#tpu.dimension_semantics<parallel>], iteration_bounds = array<i64: 1>, scalar_prefetch = 0 : i64, scratch_operands = 0 : i64, tpu.core_type = #tpu.core_type<tc>, window_params = [{transform_indices = @transform_0, window_bounds = array<i64: 16, 64>}, {pipeline_mode = #tpu.pipeline_mode<synchronous>, transform_indices = @transform_1, window_bounds = array<i64: 64, 128>}, {pipeline_mode = #tpu.pipeline_mode<synchronous>, transform_indices = @transform_2, window_bounds = array<i64: 1, 128>}, {transform_indices = @transform_3, window_bounds = array<i64: 16, 128>}]} {
    %c0 = arith.constant 0 : index
    %c0_0 = arith.constant 0 : index
    %0 = vector.load %arg1[%c0, %c0_0] : memref<16x64xf32, #tpu.memory_space<vmem>>, vector<16x64xf32>
    %c0_1 = arith.constant 0 : index
    %c0_2 = arith.constant 0 : index
    %1 = vector.load %arg2[%c0_1, %c0_2] : memref<64x128xf32, #tpu.memory_space<vmem>>, vector<64x128xf32>
    %cst = arith.constant dense<0.000000e+00> : vector<16x128xf32>
    %2 = tpu.matmul %0, %1, %cst {dimension_numbers = #tpu.dot_dimension_numbers<[1], [0], [0], [1], [0, 0, 1, 1], [], []>} : vector<16x64xf32>, vector<64x128xf32>, vector<16x128xf32> -> vector<16x128xf32>
    %c0_3 = arith.constant 0 : index
    %c0_4 = arith.constant 0 : index
    %3 = vector.load %arg3[%c0_3, %c0_4] : memref<1x128xf32, #tpu.memory_space<vmem>>, vector<1x128xf32>
    %4 = vector.broadcast %3 : vector<1x128xf32> to vector<16x128xf32>
    %5 = arith.addf %2, %4 : vector<16x128xf32>
    %c0_5 = arith.constant 0 : index
    %c0_6 = arith.constant 0 : index
    %6 = vector.load %arg4[%c0_5, %c0_6] : memref<16x128xf32, #tpu.memory_space<vmem>>, vector<16x128xf32>
    tpu.vector_store %arg4[%c0_5, %c0_6], %5 {strides = array<i32>} : memref<16x128xf32, #tpu.memory_space<vmem>>, vector<16x128xf32>,
    return
  }
  func.func @transform_0(%arg0: i32) -> (i32, i32) {
    %c0_i32 = arith.constant 0 : i32
    %c0_i32_0 = arith.constant 0 : i32
    return %arg0, %c0_i32 : i32, i32
  }
  func.func @transform_1(%arg0: i32) -> (i32, i32) {
    %c0_i32 = arith.constant 0 : i32
    %c0_i32_0 = arith.constant 0 : i32
    %c0_i32_1 = arith.constant 0 : i32
    return %c0_i32, %c0_i32_0 : i32, i32
  }
  func.func @transform_2(%arg0: i32) -> (i32, i32) {
    %c0_i32 = arith.constant 0 : i32
    %c0_i32_0 = arith.constant 0 : i32
    %c0_i32_1 = arith.constant 0 : i32
    return %c0_i32, %c0_i32_0 : i32, i32
  }
  func.func @transform_3(%arg0: i32) -> (i32, i32) {
    %c0_i32 = arith.constant 0 : i32
    %c0_i32_0 = arith.constant 0 : i32
    return %arg0, %c0_i32 : i32, i32
  }
}

</mosaic_0001>

<bundles_post_ra>
// kernel: attention_forward.1
= control target key start
LH: loop header
LB: loop body
LE: loop exit
PB: predicated region body
PF: predicated region fallthrough
CT: control target
= control target key end

     0   :  { %8 = vsyncpa [#allocation3], 0  ;;  %s308_s0 = inlined_call_operand.hbm [shape: f32[16,64], index: 0, kind: input, shape index: {}]   ;;  %s309_s1 = inlined_call_operand.hbm [shape: f32[64,128], index: 1, kind: input, shape index: {}]   ;;  %s310_s2 = inlined_call_operand.vmem [shape: f32[1,128], index: 2, kind: input, shape index: {}]   ;;  %s311_s3 = inlined_call_operand.vmem [shape: f32[16,128], index: 3, kind: output, shape index: {}]  }
   0x1   :  { %9 = vsyncpa [#allocation5], 0  ;;  %s249_s12 = smov [#allocation2]   ;;  %s201_s16 = scalar_lea.hbm %s308_s0, 256 }
   0x2   :  { %s15_s13 = sshll.u32 %s249_s12, 4  ;;  %p202_p0 = scmp.ne.s32.totalorder %s308_s0, %s201_s16  ;;  %s16_s13 = int_to_ptr.vmem [resolvable:$true] %s15_s13 }
   0x3   :  { %p205_p1 = scmp.lt.u32.totalorder %s201_s16, %s308_s0 }
   0x5   :  { %p207_p2 = pnand %p205_p1, %p202_p0 }
   0x7   :  { %210 = shalt.err (!%p207_p2)
}
   0x8   :  { %s211_s21 = scalar_lea.vmem %s16_s13, 256  ;;  %p216_p4 = scmp.lt.s32.totalorder %s16_s13, %s16_s13 }
   0x9   :  { %p212_p3 = scmp.ne.s32.totalorder %s16_s13, %s211_s21  ;;  %p217_p5 = scmp.lt.s32.totalorder %s211_s21, %s211_s21 }
   0xb   :  { %p218_p6 = por %p217_p5, %p216_p4 }
   0xd   :  { %p219_p7 = pnand %p218_p6, %p212_p3 }
   0xf   :  { %222 = shalt.err (!%p219_p7)
}
  0x10   :  { %s250_s22 = smov 128   ;;  %s251_s23 = smov 8  }
  0x11   :  { %21 = dma.hbm_to_vmem [thread:$0]  %s308_s0, 256, %s16_s13, [#allocation3], %s250_s22, %s250_s22, %s251_s23  }
  0x12   :  { %s252_s26 = smov [#allocation4]   ;;  %s223_s30 = scalar_lea.hbm %s309_s1, 1024 }
  0x13   :  { %s27_s27 = sshll.u32 %s252_s26, 4  ;;  %p224_p8 = scmp.ne.s32.totalorder %s309_s1, %s223_s30  ;;  %s28_s27 = int_to_ptr.vmem [resolvable:$true] %s27_s27 }
  0x14   :  { %p227_p9 = scmp.lt.u32.totalorder %s223_s30, %s309_s1 }
  0x16   :  { %p229_p10 = pnand %p227_p9, %p224_p8 }
  0x18   :  { %232 = shalt.err (!%p229_p10)
}
  0x19   :  { %s233_s8 = scalar_lea.vmem %s28_s27, 1024  ;;  %p238_p12 = scmp.lt.s32.totalorder %s28_s27, %s28_s27 }
  0x1a   :  { %p234_p11 = scmp.ne.s32.totalorder %s28_s27, %s233_s8  ;;  %p239_p13 = scmp.lt.s32.totalorder %s233_s8, %s233_s8 }
  0x1c   :  { %p240_p0 = por %p239_p13, %p238_p12 }
  0x1e   :  { %p241_p1 = pnand %p240_p0, %p234_p11 }
  0x20   :  { %244 = shalt.err (!%p241_p1)
}
  0x21   :  { %33 = dma.hbm_to_vmem [thread:$0]  %s309_s1, 1024, %s28_s27, [#allocation5], %s250_s22, %s250_s22, %s251_s23  }
  0x22   :  { %245 = dma.done.wait [#allocation3], 256  }
  0x23   :  { %246 = vsyncadd [#allocation3], 4294967040 }
  0x24   :  { %247 = dma.done.wait [#allocation5], 1024  }
  0x25   :  { %248 = vsyncadd [#allocation5], 4294966272  ;;  %v44_v0 = vld [vmem:[#allocation4] sm:$0xff]  ;;  %v45_v1 = vld [vmem:[#allocation4 + $0x8] sm:$0xff]  ;;  %vm59_vm0 = vcmask 523264  }
  0x26   :  { %v46_v2 = vld [vmem:[#allocation4 + $0x10] sm:$0xff]  ;;  %v181_v3 = vpack.c.bf16 %v45_v1, %v44_v0  ;;  %v47_v4 = vld [vmem:[#allocation4 + $0x18] sm:$0xff]  ;;  %v48_v6 = vld [vmem:[#allocation4 + $0x20] sm:$0xff] }
  0x27   :  { %v185_v5 = vpack.c.bf16 %v47_v4, %v46_v2  ;;  %v49_v7 = vld [vmem:[#allocation4 + $0x28] sm:$0xff]  ;;  %v42_v8 = vld [vmem:[#allocation2] sm:$0xff]  ;;  %v51_v11 = vld [vmem:[#allocation4 + $0x38] sm:$0xff] }
  0x28   :  { %182 = vmatprep.subr.bf16.mxu0 %v181_v3  ;;  %178 = vmatprep.mubr.msk.f32.mxu0 %vm59_vm0, %v42_v8  ;;  %v189_v9 = vpack.c.bf16 %v49_v7, %v48_v6  ;;  %v50_v10 = vld [vmem:[#allocation4 + $0x30] sm:$0xff]  ;;  %v43_v13 = vld [vmem:[#allocation2 + $0x8] sm:$0xff] }
  0x29   :  { %184 = vmatpush3.bf16.msra.mxu0 %v181_v3  ;;  %v193_v12 = vpack.c.bf16 %v51_v11, %v50_v10  ;;  %v149_v14 = vld [vmem:[%s310_s2] ss:$0 sm:$0xff] }
  0x2a   :  { %186 = vmatprep.subr.bf16.mxu0 %v185_v5 }
  0x2d   :  { %188 = vmatpush3.bf16.msra.mxu0 %v185_v5 }
  0x2e   :  { %190 = vmatprep.subr.bf16.mxu0 %v189_v9 }
  0x31   :  { %192 = vmatpush3.bf16.msra.mxu0 %v189_v9 }
  0x32   :  { %194 = vmatprep.subr.bf16.mxu0 %v193_v12 }
  0x35   :  { %196 = vmatpush3.bf16.msra.mxu0 %v193_v12 }
  0x38   :  { %179 = vmatmul.mubr.msk.f32.vlgmr.msra.gmra.mrb[0].mxu0 %vm59_vm0, %v43_v13 }
 0x10b   :  { %v180_v15 = vpop.f32.mrb[0].mxu0 }
 0x10c   :  { %v138_v16 = vadd.f32 %v180_v15, %v149_v14  ;;  %v132_v17 = vpop.f32.mrb[1].mxu0 }
 0x10d   :  { %v133_v18 = vadd.f32 %v149_v14, %v132_v17 }
 0x10e   :  { %142 = vst [vmem:[%s311_s3 + $0x8] sm:$0xff] %v138_v16 }
 0x10f   :  { %141 = vst [vmem:[%s311_s3] sm:$0xff] %v133_v18 }
 0x110   :  { %147 = vsyncpa [#allocation3], 1 }
 0x111   :  { %148 = vsyncpa [#allocation5], 1 }

</bundles_post_ra>
